<compile_context>
chip_gen: v7x
topology: tpu7x:2x2x1
jax: 0.10.0
libtpu: 0.0.40
codegen_flags: <defaults>
</compile_context>

<pallas_src>
import functools

import jax
import jax.numpy as jnp
from jax.experimental import pallas as pl
from jax.experimental.pallas import tpu as pltpu

_LANE = 128
_SUBLANE = 8


def _round_up(x, m):
    return ((x + m - 1) // m) * m


def _rpn_regr_loss_kernel(yt_ref, yp_ref, loss_ref, cnt_ref,
                          loss_acc, keep_acc, *, sigma):
    """Grid = (n_par, n_steps).  Accumulates masked smooth-L1 sums per core.

    yt_ref: (3, tr, 128)  channel-major target tile  [cls, t0, t1]
    yp_ref: (2, tr, 128)  channel-major pred tile    [p0, p1]
    loss_ref / cnt_ref: (1, 1, 128) per-core partial results (scalar broadcast)
    loss_acc / keep_acc: (tr, 128) f32 VMEM running accumulators
    """
    j = pl.program_id(1)

    @pl.when(j == 0)
    def _init():
        loss_acc[...] = jnp.zeros_like(loss_acc)
        keep_acc[...] = jnp.zeros_like(keep_acc)

    cls = yt_ref[0]
    keep = (cls == jnp.float32(1.0)).astype(jnp.float32)

    inv_sigma = 1.0 / sigma

    def smooth_l1(true, pred):
        diff = jnp.abs(true - pred)
        less_one = (diff < inv_sigma).astype(jnp.float32)
        return (less_one * (0.5 * sigma) * diff * diff
                + jnp.abs(1.0 - less_one) * (diff - 0.5 * inv_sigma))

    # per-anchor loss = sum over the 2 regression channels (torch.sum(loss, 1))
    per_anchor = smooth_l1(yt_ref[1], yp_ref[0]) + smooth_l1(yt_ref[2], yp_ref[1])

    # cheap VPU adds every step; expensive cross-lane reduce only once below
    loss_acc[...] += per_anchor * keep
    keep_acc[...] += keep

    @pl.when(j == pl.num_programs(1) - 1)
    def _finalize():
        loss_ref[...] = jnp.zeros_like(loss_ref) + jnp.sum(loss_acc[...])
        cnt_ref[...] = jnp.zeros_like(cnt_ref) + jnp.sum(keep_acc[...])


def rpn_regr_loss(y_pred, y_true, sigma=9.0, tile_rows=1024):
    """y_pred: (B, N, 2) f32, y_true: (B, N, 3) f32 -> scalar f32 loss."""
    B, N, Ct = y_true.shape
    assert Ct == 3 and y_pred.shape == (B, N, 2)

    total = B * N
    tile_rows = _round_up(max(int(tile_rows), _SUBLANE), _SUBLANE)
    rows_needed = _round_up(-(-total // _LANE), _SUBLANE)

    if rows_needed <= tile_rows:
        n_par, n_steps, tr = 1, 1, rows_needed
    else:
        # 2-way split benefits v7x's two TensorCores; it is a cheap 2-iteration
        # outer loop on single-core chips.
        n_par = 2 if rows_needed >= 2 * tile_rows else 1
        tr = tile_rows
        n_steps = -(-rows_needed // (n_par * tr))

    rows_total = n_par * n_steps * tr
    padded_total = rows_total * _LANE
    pad = padded_total - total

    # One channel-major transpose per input (instead of five strided slices);
    # zero padding is safe: padded cls == 0 -> keep mask == 0.
    yt = jnp.moveaxis(y_true.astype(jnp.float32), -1, 0).reshape(3, total)
    yp = jnp.moveaxis(y_pred.astype(jnp.float32), -1, 0).reshape(2, total)
    if pad:
        yt = jnp.pad(yt, ((0, 0), (0, pad)))
        yp = jnp.pad(yp, ((0, 0), (0, pad)))
    yt = yt.reshape(3, rows_total, _LANE)
    yp = yp.reshape(2, rows_total, _LANE)

    def row_block(i, j):
        return (0, i * n_steps + j, 0)

    out_spec = pl.BlockSpec((1, 1, _LANE), lambda i, j: (i, 0, 0))
    out_shape = jax.ShapeDtypeStruct((n_par, 1, _LANE), jnp.float32)

    part_loss, part_cnt = pl.pallas_call(
        functools.partial(_rpn_regr_loss_kernel, sigma=float(sigma)),
        grid=(n_par, n_steps),
        in_specs=[pl.BlockSpec((3, tr, _LANE), row_block),
                  pl.BlockSpec((2, tr, _LANE), row_block)],
        out_specs=(out_spec, out_spec),
        out_shape=(out_shape, out_shape),
        scratch_shapes=[pltpu.VMEM((tr, _LANE), jnp.float32),
                        pltpu.VMEM((tr, _LANE), jnp.float32)],
        compiler_params=pltpu.CompilerParams(
            dimension_semantics=("parallel", "arbitrary")),
    )(yt, yp)

    loss_sum = jnp.sum(part_loss[:, 0, 0])
    keep_cnt = jnp.sum(part_cnt[:, 0, 0])

    # mean over kept anchors; 0.0 when nothing is kept (mirrors loss.numel() check)
    return jnp.where(keep_cnt > 0.0, loss_sum / keep_cnt, jnp.float32(0.0))


def rpn_regr_loss_ref(y_pred, y_true, sigma=9.0):
    """Pure-JAX reference of the PyTorch forward."""
    cls = y_true[:, :, 0]
    regr = y_true[:, :, 1:3]
    keep = (cls == 1.0).astype(jnp.float32)
    diff = jnp.abs(regr - y_pred)
    less_one = (diff < 1.0 / sigma).astype(jnp.float32)
    loss = less_one * 0.5 * diff * diff * sigma + jnp.abs(1.0 - less_one) * (diff - 0.5 / sigma)
    per_anchor = jnp.sum(loss, axis=-1)
    k = jnp.sum(keep)
    return jnp.where(k > 0.0, jnp.sum(per_anchor * keep) / k, jnp.float32(0.0))


if __name__ == "__main__":
    # No learnable parameters in this module; only the hyperparameter sigma=9.0.
    key = jax.random.PRNGKey(0)
    k_cls, k_true, k_pred = jax.random.split(key, 3)

    B, N = 2, 256  # small shapes: (batch, anchors, channels)
    cls = jax.random.bernoulli(k_cls, 0.3, (B, N)).astype(jnp.float32)   # some anchors kept
    regr_true = jax.random.normal(k_true, (B, N, 2), dtype=jnp.float32)
    y_true = jnp.concatenate([cls[..., None], regr_true], axis=-1)       # (B, N, 3)
    y_pred = jax.random.normal(k_pred, (B, N, 2), dtype=jnp.float32)     # (B, N, 2)

    loss = rpn_regr_loss(y_pred, y_true, sigma=9.0)
    loss = jax.block_until_ready(loss)

    ref = rpn_regr_loss_ref(y_pred, y_true, sigma=9.0)
    assert jnp.allclose(loss, ref, atol=1e-5, rtol=1e-5), (loss, ref)

    # also exercise the multi-step / 2-way parallel path with a larger input
    B2, N2 = 4, 131072
    k2a, k2b, k2c = jax.random.split(jax.random.PRNGKey(1), 3)
    cls2 = jax.random.bernoulli(k2a, 0.1, (B2, N2)).astype(jnp.float32)
    yt2 = jnp.concatenate([cls2[..., None],
                           jax.random.normal(k2b, (B2, N2, 2), dtype=jnp.float32)], axis=-1)
    yp2 = jax.random.normal(k2c, (B2, N2, 2), dtype=jnp.float32)
    loss2 = jax.block_until_ready(rpn_regr_loss(yp2, yt2, sigma=9.0))
    ref2 = rpn_regr_loss_ref(yp2, yt2, sigma=9.0)
    assert jnp.allclose(loss2, ref2, atol=1e-4, rtol=1e-4), (loss2, ref2)

    print("KERNEL_OK")
</pallas_src>

<mosaic_0001>
module attributes {stable_mosaic.version = 11 : i64} {
  func.func @_rpn_regr_loss_kernel(%arg0: i32, %arg1: i32, %arg2: memref<3x8x128xf32, #tpu.memory_space<vmem>>, %arg3: memref<2x8x128xf32, #tpu.memory_space<vmem>>, %arg4: memref<1x1x128xf32, #tpu.memory_space<vmem>>, %arg5: memref<1x1x128xf32, #tpu.memory_space<vmem>>, %arg6: memref<8x128xf32, #tpu.memory_space<vmem>>, %arg7: memref<8x128xf32, #tpu.memory_space<vmem>>) attributes {dimension_semantics = [#tpu.dimension_semantics<parallel>, #tpu.dimension_semantics<arbitrary>], iteration_bounds = array<i64: 1, 1>, scalar_prefetch = 0 : i64, scratch_operands = 2 : i64, tpu.core_type = #tpu.core_type<tc>, window_params = [{transform_indices = @transform_0, window_bounds = array<i64: 3, 8, 128>}, {transform_indices = @transform_1, window_bounds = array<i64: 2, 8, 128>}, {transform_indices = @transform_2, window_bounds = array<i64: 1, 1, 128>}, {transform_indices = @transform_3, window_bounds = array<i64: 1, 1, 128>}]} {
    %c0_i32 = arith.constant 0 : i32
    %0 = arith.cmpi eq, %arg1, %c0_i32 : i32
    %1 = arith.extui %0 : i1 to i32
    %c0_i32_0 = arith.constant 0 : i32
    %2 = arith.cmpi ne, %1, %c0_i32_0 : i32
    scf.if %2 {
      %cst_31 = arith.constant 0.000000e+00 : f32
      %62 = vector.broadcast %cst_31 : f32 to vector<8x128xf32>
      %c0_32 = arith.constant 0 : index
      %c0_33 = arith.constant 0 : index
      %63 = vector.load %arg6[%c0_32, %c0_33] : memref<8x128xf32, #tpu.memory_space<vmem>>, vector<8x128xf32>
      tpu.vector_store %arg6[%c0_32, %c0_33], %62 {strides = array<i32>} : memref<8x128xf32, #tpu.memory_space<vmem>>, vector<8x128xf32>,
      %cst_34 = arith.constant 0.000000e+00 : f32
      %64 = vector.broadcast %cst_34 : f32 to vector<8x128xf32>
      %c0_35 = arith.constant 0 : index
      %c0_36 = arith.constant 0 : index
      %65 = vector.load %arg7[%c0_35, %c0_36] : memref<8x128xf32, #tpu.memory_space<vmem>>, vector<8x128xf32>
      tpu.vector_store %arg7[%c0_35, %c0_36], %64 {strides = array<i32>} : memref<8x128xf32, #tpu.memory_space<vmem>>, vector<8x128xf32>,
    } else {
    }
    %c0 = arith.constant 0 : index
    %c0_1 = arith.constant 0 : index
    %c0_2 = arith.constant 0 : index
    %3 = vector.load %arg2[%c0, %c0_1, %c0_2] : memref<3x8x128xf32, #tpu.memory_space<vmem>>, vector<1x8x128xf32>
    %4 = vector.shape_cast %3 : vector<1x8x128xf32> to vector<8x128xf32>
    %cst = arith.constant 1.000000e+00 : f32
    %5 = vector.broadcast %cst : f32 to vector<8x128xf32>
    %6 = arith.cmpf oeq, %4, %5 : vector<8x128xf32>
    %7 = arith.extui %6 : vector<8x128xi1> to vector<8x128xi32>
    %8 = arith.sitofp %7 : vector<8x128xi32> to vector<8x128xf32>
    %c1 = arith.constant 1 : index
    %c0_3 = arith.constant 0 : index
    %c0_4 = arith.constant 0 : index
    %9 = vector.load %arg2[%c1, %c0_3, %c0_4] : memref<3x8x128xf32, #tpu.memory_space<vmem>>, vector<1x8x128xf32>
    %10 = vector.shape_cast %9 : vector<1x8x128xf32> to vector<8x128xf32>
    %c0_5 = arith.constant 0 : index
    %c0_6 = arith.constant 0 : index
    %c0_7 = arith.constant 0 : index
    %11 = vector.load %arg3[%c0_5, %c0_6, %c0_7] : memref<2x8x128xf32, #tpu.memory_space<vmem>>, vector<1x8x128xf32>
    %12 = vector.shape_cast %11 : vector<1x8x128xf32> to vector<8x128xf32>
    %13 = arith.subf %10, %12 : vector<8x128xf32>
    %14 = math.absf %13 : vector<8x128xf32>
    %cst_8 = arith.constant 0.111111112 : f32
    %15 = vector.broadcast %cst_8 : f32 to vector<8x128xf32>
    %16 = arith.cmpf olt, %14, %15 : vector<8x128xf32>
    %17 = arith.extui %16 : vector<8x128xi1> to vector<8x128xi32>
    %18 = arith.sitofp %17 : vector<8x128xi32> to vector<8x128xf32>
    %cst_9 = arith.constant 4.500000e+00 : f32
    %19 = vector.broadcast %cst_9 : f32 to vector<8x128xf32>
    %20 = arith.mulf %18, %19 : vector<8x128xf32>
    %21 = arith.mulf %20, %14 : vector<8x128xf32>
    %22 = arith.mulf %21, %14 : vector<8x128xf32>
    %cst_10 = arith.constant 1.000000e+00 : f32
    %23 = vector.broadcast %cst_10 : f32 to vector<8x128xf32>
    %24 = arith.subf %23, %18 : vector<8x128xf32>
    %25 = math.absf %24 : vector<8x128xf32>
    %cst_11 = arith.constant 0.055555556 : f32
    %26 = vector.broadcast %cst_11 : f32 to vector<8x128xf32>
    %27 = arith.subf %14, %26 : vector<8x128xf32>
    %28 = arith.mulf %25, %27 : vector<8x128xf32>
    %29 = arith.addf %22, %28 : vector<8x128xf32>
    %c2 = arith.constant 2 : index
    %c0_12 = arith.constant 0 : index
    %c0_13 = arith.constant 0 : index
    %30 = vector.load %arg2[%c2, %c0_12, %c0_13] : memref<3x8x128xf32, #tpu.memory_space<vmem>>, vector<1x8x128xf32>
    %31 = vector.shape_cast %30 : vector<1x8x128xf32> to vector<8x128xf32>
    %c1_14 = arith.constant 1 : index
    %c0_15 = arith.constant 0 : index
    %c0_16 = arith.constant 0 : index
    %32 = vector.load %arg3[%c1_14, %c0_15, %c0_16] : memref<2x8x128xf32, #tpu.memory_space<vmem>>, vector<1x8x128xf32>
    %33 = vector.shape_cast %32 : vector<1x8x128xf32> to vector<8x128xf32>
    %34 = arith.subf %31, %33 : vector<8x128xf32>
    %35 = math.absf %34 : vector<8x128xf32>
    %cst_17 = arith.constant 0.111111112 : f32
    %36 = vector.broadcast %cst_17 : f32 to vector<8x128xf32>
    %37 = arith.cmpf olt, %35, %36 : vector<8x128xf32>
    %38 = arith.extui %37 : vector<8x128xi1> to vector<8x128xi32>
    %39 = arith.sitofp %38 : vector<8x128xi32> to vector<8x128xf32>
    %cst_18 = arith.constant 4.500000e+00 : f32
    %40 = vector.broadcast %cst_18 : f32 to vector<8x128xf32>
    %41 = arith.mulf %39, %40 : vector<8x128xf32>
    %42 = arith.mulf %41, %35 : vector<8x128xf32>
    %43 = arith.mulf %42, %35 : vector<8x128xf32>
    %cst_19 = arith.constant 1.000000e+00 : f32
    %44 = vector.broadcast %cst_19 : f32 to vector<8x128xf32>
    %45 = arith.subf %44, %39 : vector<8x128xf32>
    %46 = math.absf %45 : vector<8x128xf32>
    %cst_20 = arith.constant 0.055555556 : f32
    %47 = vector.broadcast %cst_20 : f32 to vector<8x128xf32>
    %48 = arith.subf %35, %47 : vector<8x128xf32>
    %49 = arith.mulf %46, %48 : vector<8x128xf32>
    %50 = arith.addf %43, %49 : vector<8x128xf32>
    %51 = arith.addf %29, %50 : vector<8x128xf32>
    %c0_21 = arith.constant 0 : index
    %c0_22 = arith.constant 0 : index
    %52 = vector.load %arg6[%c0_21, %c0_22] : memref<8x128xf32, #tpu.memory_space<vmem>>, vector<8x128xf32>
    %53 = arith.mulf %51, %8 : vector<8x128xf32>
    %54 = arith.addf %52, %53 : vector<8x128xf32>
    %c0_23 = arith.constant 0 : index
    %c0_24 = arith.constant 0 : index
    %55 = vector.load %arg6[%c0_23, %c0_24] : memref<8x128xf32, #tpu.memory_space<vmem>>, vector<8x128xf32>
    tpu.vector_store %arg6[%c0_23, %c0_24], %54 {strides = array<i32>} : memref<8x128xf32, #tpu.memory_space<vmem>>, vector<8x128xf32>,
    %c0_25 = arith.constant 0 : index
    %c0_26 = arith.constant 0 : index
    %56 = vector.load %arg7[%c0_25, %c0_26] : memref<8x128xf32, #tpu.memory_space<vmem>>, vector<8x128xf32>
    %57 = arith.addf %56, %8 : vector<8x128xf32>
    %c0_27 = arith.constant 0 : index
    %c0_28 = arith.constant 0 : index
    %58 = vector.load %arg7[%c0_27, %c0_28] : memref<8x128xf32, #tpu.memory_space<vmem>>, vector<8x128xf32>
    tpu.vector_store %arg7[%c0_27, %c0_28], %57 {strides = array<i32>} : memref<8x128xf32, #tpu.memory_space<vmem>>, vector<8x128xf32>,
    %c0_i32_29 = arith.constant 0 : i32
    %59 = arith.cmpi eq, %arg1, %c0_i32_29 : i32
    %60 = arith.extui %59 : i1 to i32
    %c0_i32_30 = arith.constant 0 : i32
    %61 = arith.cmpi ne, %60, %c0_i32_30 : i32
    scf.if %61 {
      %cst_31 = arith.constant 0.000000e+00 : f32
      %62 = vector.broadcast %cst_31 : f32 to vector<1x1x128xf32>
      %c0_32 = arith.constant 0 : index
      %c0_33 = arith.constant 0 : index
      %63 = vector.load %arg6[%c0_32, %c0_33] : memref<8x128xf32, #tpu.memory_space<vmem>>, vector<8x128xf32>
      %64 = vector.shape_cast %63 : vector<8x128xf32> to vector<1x8x128xf32>
      %cst_34 = arith.constant dense<0.000000e+00> : vector<1xf32>
      %65 = vector.multi_reduction <add>, %64, %cst_34 [1, 2] : vector<1x8x128xf32> to vector<1xf32>
      %66 = vector.shape_cast %65 : vector<1xf32> to vector<1x1x1xf32>
      %67 = vector.extract %66[0, 0, 0] : f32 from vector<1x1x1xf32>
      %68 = vector.broadcast %67 : f32 to vector<1x1x128xf32>
      %69 = arith.addf %62, %68 : vector<1x1x128xf32>
      %c0_35 = arith.constant 0 : index
      %c0_36 = arith.constant 0 : index
      %c0_37 = arith.constant 0 : index
      %70 = vector.load %arg4[%c0_35, %c0_36, %c0_37] : memref<1x1x128xf32, #tpu.memory_space<vmem>>, vector<1x1x128xf32>
      tpu.vector_store %arg4[%c0_35, %c0_36, %c0_37], %69 {strides = array<i32>} : memref<1x1x128xf32, #tpu.memory_space<vmem>>, vector<1x1x128xf32>,
      %cst_38 = arith.constant 0.000000e+00 : f32
      %71 = vector.broadcast %cst_38 : f32 to vector<1x1x128xf32>
      %c0_39 = arith.constant 0 : index
      %c0_40 = arith.constant 0 : index
      %72 = vector.load %arg7[%c0_39, %c0_40] : memref<8x128xf32, #tpu.memory_space<vmem>>, vector<8x128xf32>
      %73 = vector.shape_cast %72 : vector<8x128xf32> to vector<1x8x128xf32>
      %cst_41 = arith.constant dense<0.000000e+00> : vector<1xf32>
      %74 = vector.multi_reduction <add>, %73, %cst_41 [1, 2] : vector<1x8x128xf32> to vector<1xf32>
      %75 = vector.shape_cast %74 : vector<1xf32> to vector<1x1x1xf32>
      %76 = vector.extract %75[0, 0, 0] : f32 from vector<1x1x1xf32>
      %77 = vector.broadcast %76 : f32 to vector<1x1x128xf32>
      %78 = arith.addf %71, %77 : vector<1x1x128xf32>
      %c0_42 = arith.constant 0 : index
      %c0_43 = arith.constant 0 : index
      %c0_44 = arith.constant 0 : index
      %79 = vector.load %arg5[%c0_42, %c0_43, %c0_44] : memref<1x1x128xf32, #tpu.memory_space<vmem>>, vector<1x1x128xf32>
      tpu.vector_store %arg5[%c0_42, %c0_43, %c0_44], %78 {strides = array<i32>} : memref<1x1x128xf32, #tpu.memory_space<vmem>>, vector<1x1x128xf32>,
    } else {
    }
    return
  }
  func.func @transform_0(%arg0: i32, %arg1: i32) -> (i32, i32, i32) {
    %c1_i32 = arith.constant 1 : i32
    %0 = arith.muli %arg0, %c1_i32 : i32
    %1 = arith.addi %0, %arg1 : i32
    %c0_i32 = arith.constant 0 : i32
    %c0_i32_0 = arith.constant 0 : i32
    %c0_i32_1 = arith.constant 0 : i32
    return %c0_i32, %1, %c0_i32_0 : i32, i32, i32
  }
  func.func @transform_1(%arg0: i32, %arg1: i32) -> (i32, i32, i32) {
    %c1_i32 = arith.constant 1 : i32
    %0 = arith.muli %arg0, %c1_i32 : i32
    %1 = arith.addi %0, %arg1 : i32
    %c0_i32 = arith.constant 0 : i32
    %c0_i32_0 = arith.constant 0 : i32
    %c0_i32_1 = arith.constant 0 : i32
    return %c0_i32, %1, %c0_i32_0 : i32, i32, i32
  }
  func.func @transform_2(%arg0: i32, %arg1: i32) -> (i32, i32, i32) {
    %c0_i32 = arith.constant 0 : i32
    %c0_i32_0 = arith.constant 0 : i32
    %c0_i32_1 = arith.constant 0 : i32
    return %arg0, %c0_i32, %c0_i32_0 : i32, i32, i32
  }
  func.func @transform_3(%arg0: i32, %arg1: i32) -> (i32, i32, i32) {
    %c0_i32 = arith.constant 0 : i32
    %c0_i32_0 = arith.constant 0 : i32
    %c0_i32_1 = arith.constant 0 : i32
    return %arg0, %c0_i32, %c0_i32_0 : i32, i32, i32
  }
}

</mosaic_0001>

<bundles_post_ra>
// kernel: tpu_custom_call.1
= control target key start
LH: loop header
LB: loop body
LE: loop exit
PB: predicated region body
PF: predicated region fallthrough
CT: control target
= control target key end

     0   :  { %9 = vsyncpa [#allocation5], 0  ;;  %s348_s0 = inlined_call_operand.hbm [shape: f32[3,8,128], index: 0, kind: input, shape index: {}]   ;;  %s349_s1 = inlined_call_operand.hbm [shape: f32[2,8,128], index: 1, kind: input, shape index: {}]   ;;  %s350_s2 = inlined_call_operand.hbm [shape: f32[1,1,128], index: 2, kind: output, shape index: {0}]   ;;  %s351_s3 = inlined_call_operand.hbm [shape: f32[1,1,128], index: 3, kind: output, shape index: {1}]  }
   0x1   :  { %10 = vsyncpa [#allocation8], 0 }
   0x2   :  { %11 = vsyncpa [#allocation6], 0 }
   0x3   :  { %12 = vsyncpa [#allocation11], 0  ;;  %s273_s12 = smov [#allocation4]   ;;  %s177_s16 = scalar_lea.hbm %s348_s0, 384 }
   0x4   :  { %s21_s13 = sshll.u32 %s273_s12, 4  ;;  %p178_p0 = scmp.ne.s32.totalorder %s348_s0, %s177_s16  ;;  %s22_s13 = int_to_ptr.vmem [resolvable:$true] %s21_s13 }
   0x5   :  { %p181_p1 = scmp.lt.u32.totalorder %s177_s16, %s348_s0 }
   0x7   :  { %p183_p2 = pnand %p181_p1, %p178_p0 }
   0x9   :  { %186 = shalt.err (!%p183_p2)
}
   0xa   :  { %s187_s21 = scalar_lea.vmem %s22_s13, 384  ;;  %p192_p4 = scmp.lt.s32.totalorder %s22_s13, %s22_s13 }
   0xb   :  { %p188_p3 = scmp.ne.s32.totalorder %s22_s13, %s187_s21  ;;  %p193_p5 = scmp.lt.s32.totalorder %s187_s21, %s187_s21 }
   0xd   :  { %p194_p6 = por %p193_p5, %p192_p4 }
   0xf   :  { %p195_p7 = pnand %p194_p6, %p188_p3 }
  0x11   :  { %198 = shalt.err (!%p195_p7)
}
  0x12   :  { %s274_s22 = smov 128   ;;  %s275_s23 = smov 8  }
  0x13   :  { %27 = dma.hbm_to_vmem [thread:$0]  %s348_s0, 384, %s22_s13, [#allocation5], %s274_s22, %s274_s22, %s275_s23  }
  0x14   :  { %s276_s26 = smov [#allocation7]   ;;  %s199_s30 = scalar_lea.hbm %s349_s1, 256 }
  0x15   :  { %s36_s27 = sshll.u32 %s276_s26, 4  ;;  %p200_p8 = scmp.ne.s32.totalorder %s349_s1, %s199_s30  ;;  %s37_s27 = int_to_ptr.vmem [resolvable:$true] %s36_s27 }
  0x16   :  { %p203_p9 = scmp.lt.u32.totalorder %s199_s30, %s349_s1 }
  0x18   :  { %p205_p10 = pnand %p203_p9, %p200_p8 }
  0x1a   :  { %208 = shalt.err (!%p205_p10)
}
  0x1b   :  { %s209_s8 = scalar_lea.vmem %s37_s27, 256  ;;  %p214_p12 = scmp.lt.s32.totalorder %s37_s27, %s37_s27 }
  0x1c   :  { %p210_p11 = scmp.ne.s32.totalorder %s37_s27, %s209_s8  ;;  %p215_p13 = scmp.lt.s32.totalorder %s209_s8, %s209_s8 }
  0x1e   :  { %p216_p0 = por %p215_p13, %p214_p12 }
  0x20   :  { %p217_p1 = pnand %p216_p0, %p210_p11 }
  0x22   :  { %220 = shalt.err (!%p217_p1)
}
  0x23   :  { %42 = dma.hbm_to_vmem [thread:$0]  %s349_s1, 256, %s37_s27, [#allocation8], %s274_s22, %s274_s22, %s275_s23  }
  0x24   :  { %265 = dma.done.wait [#allocation5], 384  }
  0x25   :  { %266 = vsyncadd [#allocation5], 4294966912 }
  0x26   :  { %267 = dma.done.wait [#allocation8], 256  }
  0x27   :  { %268 = vsyncadd [#allocation8], 4294967040  ;;  %v62_v0 = vld [vmem:[#allocation4 + $0x8] sm:$0xff]  ;;  %v63_v1 = vld [vmem:[#allocation7] sm:$0xff]  ;;  %v277_v8 = vmov 0.0   ;;  %s278_s1 = smov [#allocation9]  }
  0x28   :  { %v64_v2 = vsub.f32 %v62_v0, %v63_v1  ;;  %v78_v3 = vld [vmem:[#allocation4 + $0x10] sm:$0xff]  ;;  %v80_v4 = vld [vmem:[#allocation7 + $0x8] sm:$0xff]  ;;  %s137_s10 = sshll.u32 %s278_s1, 4  ;;  %s279_s12 = smov [#allocation10]   ;;  %s138_s10 = int_to_ptr.vmem [resolvable:$true] %s137_s10 }
  0x29   :  { %v81_v5 = vsub.f32 %v78_v3, %v80_v4  ;;  %v57_v17 = vld [vmem:[#allocation4] sm:$0xff]  ;;  %s147_s13 = sshll.u32 %s279_s12, 4  ;;  %s221_s14 = scalar_lea.vmem %s138_s10, 16  ;;  %s148_s13 = int_to_ptr.vmem [resolvable:$true] %s147_s13 }
  0x2a   :  { %v65_v6 = vand.u32 2147483647, %v64_v2  ;;  %vm58_vm2 = vcmp.eq.f32.partialorder %v57_v17, 1.0  ;;  %p222_p2 = scmp.ne.s32.totalorder %s138_s10, %s221_s14  ;;  %s225_s15 = scalar_lea.vmem %s138_s10, 32 }
  0x2b   :  { %v82_v7 = vand.u32 2147483647, %v81_v5  ;;  %v161_v28 = vsel %vm58_vm2, 1.0, %v277_v8  ;;  %p226_p3 = scmp.lt.s32.totalorder %s138_s10, %s138_s10  ;;  %p227_p4 = scmp.lt.s32.totalorder %s225_s15, %s221_s14 }
  0x2c   :  { %vm66_vm0 = vcmp.lt.f32.partialorder %v65_v6, 0.11111111  ;;  %v163_v12 = vadd.f32 -0.055555556, %v65_v6 }
  0x2d   :  { %v162_v9 = vsel %vm66_vm0, 1.0, %v277_v8  ;;  %vm83_vm1 = vcmp.lt.f32.partialorder %v82_v7, 0.11111111  ;;  %v165_v16 = vadd.f32 -0.055555556, %v82_v7  ;;  %p228_p5 = por %p227_p4, %p226_p3 }
  0x2e   :  { %v69_v10 = vmul.f32 4.5, %v162_v9  ;;  %v72_v11 = vsub.f32 1.0, %v162_v9  ;;  %v164_v13 = vsel %vm83_vm1, 1.0, %v277_v8 }
  0x2f   :  { %v86_v14 = vmul.f32 4.5, %v164_v13  ;;  %v89_v15 = vsub.f32 1.0, %v164_v13  ;;  %p229_p6 = pnand %p228_p5, %p222_p2 }
  0x30   :  { %v70_v18 = vmul.f32 %v69_v10, %v65_v6  ;;  %v73_v19 = vand.u32 2147483647, %v72_v11 }
  0x31   :  { %v87_v20 = vmul.f32 %v86_v14, %v82_v7  ;;  %v90_v21 = vand.u32 2147483647, %v89_v15 }
  0x32   :  { %v71_v22 = vmul.f32 %v70_v18, %v65_v6  ;;  %v75_v23 = vmul.f32 %v163_v12, %v73_v19 }
  0x33   :  { %v88_v24 = vmul.f32 %v87_v20, %v82_v7  ;;  %v92_v25 = vmul.f32 %v165_v16, %v90_v21 }
  0x34   :  { %v76_v26 = vadd.f32 %v75_v23, %v71_v22 }
  0x35   :  { %v93_v27 = vadd.f32 %v92_v25, %v88_v24 }
  0x37   :  { %v94_v29 = vadd.f32 %v93_v27, %v76_v26 }
  0x39   :  { %v96_v30 = vmul.f32 %v161_v28, %v94_v29 }
  0x3b   :  { %106 = vadd.xlane.f32.xlu0 %v96_v30 }
  0x3f   :  { %119 = vadd.xlane.f32.xlu0 %v161_v28 }
  0xc8   :  { %v107_v31 = vpop.xlane.xlu0 %106 }
  0xc9   :  { %v108_v32 = vrot.slane %v107_v31, 4 }
  0xcb   :  { %v109_v33 = vadd.f32 %v108_v32, %v107_v31 }
  0xcc   :  { %v120_v34 = vpop.xlane.xlu0 %119 }
  0xcd   :  { %v110_v35 = vrot.slane %v109_v33, 2  ;;  %v121_v36 = vrot.slane %v120_v34, 4 }
  0xcf   :  { %v122_v37 = vadd.f32 %v121_v36, %v120_v34  ;;  %v111_v38 = vadd.f32 %v110_v35, %v109_v33 }
  0xd1   :  { %v123_v39 = vrot.slane %v122_v37, 2  ;;  %v112_v40 = vrot.slane %v111_v38, 1 }
  0xd3   :  { %v124_v41 = vadd.f32 %v123_v39, %v122_v37  ;;  %v113_v42 = vadd.f32 %v112_v40, %v111_v38 }
  0xd5   :  { %166 = vpush %v113_v42  ;;  %v125_v43 = vrot.slane %v124_v41, 1 }
  0xd7   :  { %v126_v44 = vadd.f32 %v125_v43, %v124_v41 }
  0xd9   :  { %168 = vpush %v126_v44 }
 0x106   :  { %s167_s11 = spop %166 }
 0x107   :  { %v115_v45 = vstv %s167_s11 }
 0x108   :  { %117 = vst [vmem:[#allocation9] sm:$0x1] %v115_v45 }
 0x109   :  { %232 = shalt.err (!%p229_p6)
}
 0x10a   :  { %s233_s18 = scalar_lea.hbm %s350_s2, 16 }
 0x10b   :  { %p234_p7 = scmp.ne.s32.totalorder %s350_s2, %s233_s18  ;;  %p237_p8 = scmp.lt.u32.totalorder %s233_s18, %s350_s2 }
 0x10d   :  { %p239_p9 = pnand %p237_p8, %p234_p7 }
 0x10f   :  { %242 = shalt.err (!%p239_p9)
}
 0x110   :  { %140 = dma.vmem_to_hbm [thread:$0]  %s138_s10, 16, %s350_s2, [#allocation6]  }
 0x111   :  { %s169_s25 = spop %168  ;;  %s243_s26 = scalar_lea.vmem %s148_s13, 16 }
 0x112   :  { %v128_v46 = vstv %s169_s25  ;;  %p244_p10 = scmp.ne.s32.totalorder %s148_s13, %s243_s26  ;;  %s247_s27 = scalar_lea.vmem %s148_s13, 32 }
 0x113   :  { %130 = vst [vmem:[#allocation10] sm:$0x1] %v128_v46  ;;  %p248_p11 = scmp.lt.s32.totalorder %s148_s13, %s148_s13  ;;  %p249_p12 = scmp.lt.s32.totalorder %s247_s27, %s243_s26 }
 0x115   :  { %p250_p13 = por %p249_p12, %p248_p11 }
 0x117   :  { %p251_p0 = pnand %p250_p13, %p244_p10 }
 0x119   :  { %254 = shalt.err (!%p251_p0)
}
 0x11a   :  { %s255_s30 = scalar_lea.hbm %s351_s3, 16 }
 0x11b   :  { %p256_p1 = scmp.ne.s32.totalorder %s351_s3, %s255_s30  ;;  %p259_p2 = scmp.lt.u32.totalorder %s255_s30, %s351_s3 }
 0x11d   :  { %p261_p3 = pnand %p259_p2, %p256_p1 }
 0x11f   :  { %264 = shalt.err (!%p261_p3)
}
 0x120   :  { %150 = dma.vmem_to_hbm [thread:$0]  %s148_s13, 16, %s351_s3, [#allocation11]  }
 0x121   :  { %269 = dma.done.wait [#allocation6], 16  }
 0x122   :  { %270 = vsyncadd [#allocation6], 4294967280 }
 0x123   :  { %271 = dma.done.wait [#allocation11], 16  }
 0x124   :  { %272 = vsyncadd [#allocation11], 4294967280 }
 0x125   :  { %157 = vsyncpa [#allocation5], 1 }
 0x126   :  { %158 = vsyncpa [#allocation8], 1 }
 0x127   :  { %159 = vsyncpa [#allocation6], 1 }
 0x128   :  { %160 = vsyncpa [#allocation11], 1 }

</bundles_post_ra>
